<compile_context>
chip_gen: v7x
topology: tpu7x:2x2x1
jax: 0.10.0
libtpu: 0.0.40
codegen_flags: <defaults>
</compile_context>

<pallas_src>
import functools

import jax
import jax.numpy as jnp
from jax.experimental import pallas as pl
from jax.experimental.pallas import tpu as pltpu


NUM_CLASSES = 8
_LANES = 128
# Per-buffer VMEM budget for one streamed x block (double-buffered by the
# pipeline).  2x this + resident weights/accumulator/output stays well under
# the v7x 64 MiB VMEM (and trivially under v5e/v6e 128 MiB).
_X_BLOCK_BUDGET_BYTES = 6 * 1024 * 1024
_VMEM_LIMIT_BYTES = 32 * 1024 * 1024


def _classifier_kernel(x_ref, w_ref, b_ref, o_ref, acc_ref, *, inv_hw):
    # x_ref: (TB, C, THW)   w_ref: (C, NPAD)   b_ref: (1, NPAD)
    # o_ref: (TB, NPAD)     acc_ref (scratch): (TB, C) f32
    j = pl.program_id(1)

    @pl.when(j == 0)
    def _():
        acc_ref[...] = jnp.zeros_like(acc_ref)

    # Partial spatial sum over the lane axis with f32 accumulation (XLU);
    # no per-element divide on the hot path.
    acc_ref[...] += jnp.sum(x_ref[...], axis=-1, dtype=jnp.float32)

    @pl.when(j == pl.num_programs(1) - 1)
    def _():
        pooled = acc_ref[...] * inv_hw                               # (TB, C)
        logits = jnp.dot(pooled, w_ref[...].astype(jnp.float32),
                         preferred_element_type=jnp.float32)         # (TB, NPAD)
        o_ref[...] = (logits + b_ref[...].astype(jnp.float32)).astype(o_ref.dtype)


def _pick_spatial_tile(hw):
    """Largest lane-dense (multiple-of-128) tile that divides HW, capped at 2048."""
    if hw % _LANES != 0:
        return hw  # full extent is always a legal block shape
    for mult in range(16, 0, -1):  # 2048 down to 128, step 128
        cand = mult * _LANES
        if cand <= hw and hw % cand == 0:
            return cand
    return min(hw, _LANES)


def _pick_batch_tile(b, c, thw, itemsize):
    """Largest divisor of B whose x block fits the per-buffer VMEM budget.

    The output block's second-to-last dim is TB, so TB must either equal B or
    be a multiple of 8.
    """
    for cand in range(b, 0, -1):
        if b % cand != 0:
            continue
        if cand != b and cand % 8 != 0:
            continue
        if cand * c * thw * itemsize <= _X_BLOCK_BUDGET_BYTES:
            return cand
    return b  # tiny inputs: full batch always fits


def classifier_wrapper_forward(x_nchw, w, b):
    """Equivalent of Classifier_Wrapper(model)(x): returns logits [B, NUM_CLASSES]."""
    B, C, H, W = x_nchw.shape
    HW = H * W
    x_flat = x_nchw.reshape(B, C, HW)  # glue reshape in plain JAX

    # Pad the tiny class dim to a full 128-lane slab (unmasked vst stores);
    # sliced back to NUM_CLASSES below.
    n_classes = w.shape[1]
    n_pad = max(_LANES, ((n_classes + _LANES - 1) // _LANES) * _LANES)
    w_pad = jnp.zeros((C, n_pad), dtype=w.dtype).at[:, :n_classes].set(w)
    b_pad = jnp.zeros((1, n_pad), dtype=b.dtype).at[0, :n_classes].set(b)

    thw = _pick_spatial_tile(HW)
    tb = _pick_batch_tile(B, C, thw, x_flat.dtype.itemsize)

    grid = (B // tb, HW // thw)
    kernel = functools.partial(_classifier_kernel, inv_hw=1.0 / float(HW))

    out_pad = pl.pallas_call(
        kernel,
        out_shape=jax.ShapeDtypeStruct((B, n_pad), jnp.float32),
        grid_spec=pltpu.PrefetchScalarGridSpec(
            num_scalar_prefetch=0,
            grid=grid,
            in_specs=[
                # Streamed activation tiles: batch-tile i, full C, spatial-tile j.
                pl.BlockSpec((tb, C, thw), lambda i, j: (i, 0, j)),
                # Weights / bias: constant block index -> VMEM-resident, no re-DMA.
                pl.BlockSpec((C, n_pad), lambda i, j: (0, 0)),
                pl.BlockSpec((1, n_pad), lambda i, j: (0, 0)),
            ],
            out_specs=pl.BlockSpec((tb, n_pad), lambda i, j: (i, 0)),
            scratch_shapes=[pltpu.VMEM((tb, C), jnp.float32)],
        ),
        compiler_params=pltpu.CompilerParams(
            # Batch axis parallel (megacore sharding), spatial reduction axis
            # arbitrary (accumulator semantics).
            dimension_semantics=("parallel", "arbitrary"),
            vmem_limit_bytes=_VMEM_LIMIT_BYTES,
        ),
    )(x_flat, w_pad, b_pad)

    return out_pad[:, :n_classes]


def _reference(x_nchw, w, b):
    pooled = jnp.mean(x_nchw.astype(jnp.float32), axis=(2, 3))  # (B, C)
    return pooled @ w.astype(jnp.float32) + b.astype(jnp.float32)


if __name__ == "__main__":
    key = jax.random.PRNGKey(0)
    kx, kw, kb = jax.random.split(key, 3)

    B, C, H, W = 2, 4, 16, 16
    x = jax.random.normal(kx, (B, C, H, W), dtype=jnp.float32)
    # Deterministic synthetic classifier-head parameters.
    # TODO(synk): the wrapped `model` is arbitrary in the PyTorch spec; we
    # implement a concrete GAP->linear classifier head as its stand-in.
    w = jax.random.normal(kw, (C, NUM_CLASSES), dtype=jnp.float32) * 0.1
    b = jax.random.normal(kb, (NUM_CLASSES,), dtype=jnp.float32) * 0.01

    logits = classifier_wrapper_forward(x, w, b)
    jax.block_until_ready(logits)

    ref = _reference(x, w, b)
    assert logits.shape == (B, NUM_CLASSES)
    assert jnp.allclose(logits, ref, atol=1e-5, rtol=1e-5)

    print("KERNEL_OK")
</pallas_src>

<mosaic_0001>
module attributes {stable_mosaic.version = 11 : i64} {
  func.func @_classifier_kernel(%arg0: i32, %arg1: i32, %arg2: memref<2x4x256xf32, #tpu.memory_space<vmem>>, %arg3: memref<4x128xf32, #tpu.memory_space<vmem>>, %arg4: memref<1x128xf32, #tpu.memory_space<vmem>>, %arg5: memref<2x128xf32, #tpu.memory_space<vmem>>, %arg6: memref<2x4xf32, #tpu.memory_space<vmem>>) attributes {dimension_semantics = [#tpu.dimension_semantics<parallel>, #tpu.dimension_semantics<arbitrary>], iteration_bounds = array<i64: 1, 1>, scalar_prefetch = 0 : i64, scratch_operands = 1 : i64, tpu.core_type = #tpu.core_type<tc>, window_params = [{transform_indices = @transform_0, window_bounds = array<i64: 2, 4, 256>}, {pipeline_mode = #tpu.pipeline_mode<synchronous>, transform_indices = @transform_1, window_bounds = array<i64: 4, 128>}, {pipeline_mode = #tpu.pipeline_mode<synchronous>, transform_indices = @transform_2, window_bounds = array<i64: 1, 128>}, {transform_indices = @transform_3, window_bounds = array<i64: 2, 128>}]} {
    %c0_i32 = arith.constant 0 : i32
    %0 = arith.cmpi eq, %arg1, %c0_i32 : i32
    %1 = arith.extui %0 : i1 to i32
    %c0_i32_0 = arith.constant 0 : i32
    %2 = arith.cmpi ne, %1, %c0_i32_0 : i32
    scf.if %2 {
      %cst_9 = arith.constant 0.000000e+00 : f32
      %11 = vector.broadcast %cst_9 : f32 to vector<2x4xf32>
      %c0_10 = arith.constant 0 : index
      %c0_11 = arith.constant 0 : index
      %12 = vector.load %arg6[%c0_10, %c0_11] : memref<2x4xf32, #tpu.memory_space<vmem>>, vector<2x4xf32>
      tpu.vector_store %arg6[%c0_10, %c0_11], %11 {strides = array<i32>} : memref<2x4xf32, #tpu.memory_space<vmem>>, vector<2x4xf32>,
    } else {
    }
    %c0 = arith.constant 0 : index
    %c0_1 = arith.constant 0 : index
    %3 = vector.load %arg6[%c0, %c0_1] : memref<2x4xf32, #tpu.memory_space<vmem>>, vector<2x4xf32>
    %c0_2 = arith.constant 0 : index
    %c0_3 = arith.constant 0 : index
    %c0_4 = arith.constant 0 : index
    %4 = vector.load %arg2[%c0_2, %c0_3, %c0_4] : memref<2x4x256xf32, #tpu.memory_space<vmem>>, vector<2x4x256xf32>
    %cst = arith.constant dense<0.000000e+00> : vector<2x4xf32>
    %5 = vector.multi_reduction <add>, %4, %cst [2] : vector<2x4x256xf32> to vector<2x4xf32>
    %6 = arith.addf %3, %5 : vector<2x4xf32>
    %c0_5 = arith.constant 0 : index
    %c0_6 = arith.constant 0 : index
    %7 = vector.load %arg6[%c0_5, %c0_6] : memref<2x4xf32, #tpu.memory_space<vmem>>, vector<2x4xf32>
    tpu.vector_store %arg6[%c0_5, %c0_6], %6 {strides = array<i32>} : memref<2x4xf32, #tpu.memory_space<vmem>>, vector<2x4xf32>,
    %c0_i32_7 = arith.constant 0 : i32
    %8 = arith.cmpi eq, %arg1, %c0_i32_7 : i32
    %9 = arith.extui %8 : i1 to i32
    %c0_i32_8 = arith.constant 0 : i32
    %10 = arith.cmpi ne, %9, %c0_i32_8 : i32
    scf.if %10 {
      %c0_9 = arith.constant 0 : index
      %c0_10 = arith.constant 0 : index
      %11 = vector.load %arg6[%c0_9, %c0_10] : memref<2x4xf32, #tpu.memory_space<vmem>>, vector<2x4xf32>
      %cst_11 = arith.constant 3.906250e-03 : f32
      %12 = vector.broadcast %cst_11 : f32 to vector<2x4xf32>
      %13 = arith.mulf %11, %12 : vector<2x4xf32>
      %c0_12 = arith.constant 0 : index
      %c0_13 = arith.constant 0 : index
      %14 = vector.load %arg3[%c0_12, %c0_13] : memref<4x128xf32, #tpu.memory_space<vmem>>, vector<4x128xf32>
      %cst_14 = arith.constant dense<0.000000e+00> : vector<2x128xf32>
      %15 = tpu.matmul %13, %14, %cst_14 {dimension_numbers = #tpu.dot_dimension_numbers<[1], [0], [0], [1], [0, 0, 1, 1], [], []>} : vector<2x4xf32>, vector<4x128xf32>, vector<2x128xf32> -> vector<2x128xf32>
      %c0_15 = arith.constant 0 : index
      %c0_16 = arith.constant 0 : index
      %16 = vector.load %arg4[%c0_15, %c0_16] : memref<1x128xf32, #tpu.memory_space<vmem>>, vector<1x128xf32>
      %17 = vector.broadcast %16 : vector<1x128xf32> to vector<2x128xf32>
      %18 = arith.addf %15, %17 : vector<2x128xf32>
      %c0_17 = arith.constant 0 : index
      %c0_18 = arith.constant 0 : index
      %19 = vector.load %arg5[%c0_17, %c0_18] : memref<2x128xf32, #tpu.memory_space<vmem>>, vector<2x128xf32>
      tpu.vector_store %arg5[%c0_17, %c0_18], %18 {strides = array<i32>} : memref<2x128xf32, #tpu.memory_space<vmem>>, vector<2x128xf32>,
    } else {
    }
    return
  }
  func.func @transform_0(%arg0: i32, %arg1: i32) -> (i32, i32, i32) {
    %c0_i32 = arith.constant 0 : i32
    %c0_i32_0 = arith.constant 0 : i32
    return %arg0, %c0_i32, %arg1 : i32, i32, i32
  }
  func.func @transform_1(%arg0: i32, %arg1: i32) -> (i32, i32) {
    %c0_i32 = arith.constant 0 : i32
    %c0_i32_0 = arith.constant 0 : i32
    %c0_i32_1 = arith.constant 0 : i32
    return %c0_i32, %c0_i32_0 : i32, i32
  }
  func.func @transform_2(%arg0: i32, %arg1: i32) -> (i32, i32) {
    %c0_i32 = arith.constant 0 : i32
    %c0_i32_0 = arith.constant 0 : i32
    %c0_i32_1 = arith.constant 0 : i32
    return %c0_i32, %c0_i32_0 : i32, i32
  }
  func.func @transform_3(%arg0: i32, %arg1: i32) -> (i32, i32) {
    %c0_i32 = arith.constant 0 : i32
    %c0_i32_0 = arith.constant 0 : i32
    return %arg0, %c0_i32 : i32, i32
  }
}

</mosaic_0001>

<bundles_post_ra>
// kernel: tpu_custom_call.1
= control target key start
LH: loop header
LB: loop body
LE: loop exit
PB: predicated region body
PF: predicated region fallthrough
CT: control target
= control target key end

     0   :  { %8 = vsyncpa [#allocation4], 0  ;;  %s356_s0 = inlined_call_operand.hbm [shape: f32[2,4,256], index: 0, kind: input, shape index: {}]   ;;  %s357_s1 = inlined_call_operand.hbm [shape: f32[4,128], index: 1, kind: input, shape index: {}]   ;;  %s358_s2 = inlined_call_operand.vmem [shape: f32[1,128], index: 2, kind: input, shape index: {}]   ;;  %s359_s3 = inlined_call_operand.hbm [shape: f32[2,128], index: 3, kind: output, shape index: {}]  }
   0x1   :  { %9 = vsyncpa [#allocation7], 0 }
   0x2   :  { %10 = vsyncpa [#allocation5], 0  ;;  %s283_s12 = smov [#allocation3]   ;;  %s211_s16 = scalar_lea.hbm %s356_s0, 256 }
   0x3   :  { %s16_s13 = sshll.u32 %s283_s12, 4  ;;  %p212_p0 = scmp.ne.s32.totalorder %s356_s0, %s211_s16  ;;  %s17_s13 = int_to_ptr.vmem [resolvable:$true] %s16_s13 }
   0x4   :  { %p215_p1 = scmp.lt.u32.totalorder %s211_s16, %s356_s0 }
   0x6   :  { %p217_p2 = pnand %p215_p1, %p212_p0 }
   0x8   :  { %220 = shalt.err (!%p217_p2)
}
   0x9   :  { %s221_s21 = scalar_lea.vmem %s17_s13, 256  ;;  %p226_p4 = scmp.lt.s32.totalorder %s17_s13, %s17_s13 }
   0xa   :  { %p222_p3 = scmp.ne.s32.totalorder %s17_s13, %s221_s21  ;;  %p227_p5 = scmp.lt.s32.totalorder %s221_s21, %s221_s21 }
   0xc   :  { %p228_p6 = por %p227_p5, %p226_p4 }
   0xe   :  { %p229_p7 = pnand %p228_p6, %p222_p3 }
  0x10   :  { %232 = shalt.err (!%p229_p7)
}
  0x11   :  { %s284_s22 = smov 128   ;;  %s285_s23 = smov 8  }
  0x12   :  { %22 = dma.hbm_to_vmem [thread:$0]  %s356_s0, 256, %s17_s13, [#allocation4], %s284_s22, %s284_s22, %s285_s23  }
  0x13   :  { %s286_s26 = smov [#allocation6]   ;;  %s233_s30 = scalar_lea.hbm %s357_s1, 64 }
  0x14   :  { %s29_s27 = sshll.u32 %s286_s26, 4  ;;  %p234_p8 = scmp.ne.s32.totalorder %s357_s1, %s233_s30  ;;  %s30_s27 = int_to_ptr.vmem [resolvable:$true] %s29_s27 }
  0x15   :  { %p237_p9 = scmp.lt.u32.totalorder %s233_s30, %s357_s1 }
  0x17   :  { %p239_p10 = pnand %p237_p9, %p234_p8 }
  0x19   :  { %242 = shalt.err (!%p239_p10)
}
  0x1a   :  { %s243_s8 = scalar_lea.vmem %s30_s27, 64  ;;  %p248_p12 = scmp.lt.s32.totalorder %s30_s27, %s30_s27 }
  0x1b   :  { %p244_p11 = scmp.ne.s32.totalorder %s30_s27, %s243_s8  ;;  %p249_p13 = scmp.lt.s32.totalorder %s243_s8, %s243_s8 }
  0x1d   :  { %p250_p0 = por %p249_p13, %p248_p12 }
  0x1f   :  { %p251_p1 = pnand %p250_p0, %p244_p11 }
  0x21   :  { %254 = shalt.err (!%p251_p1)
}
  0x22   :  { %32 = dma.hbm_to_vmem [thread:$0]  %s357_s1, 64, %s30_s27, [#allocation7]  }
  0x23   :  { %277 = dma.done.wait [#allocation4], 256  }
  0x24   :  { %278 = vsyncadd [#allocation4], 4294967040 }
  0x25   :  { %279 = dma.done.wait [#allocation7], 64  }
  0x26   :  { %280 = vsyncadd [#allocation7], 4294967232  ;;  %vm56_vm0 = vcmask 1043456   ;;  %v48_v0 = vld [vmem:[#allocation3] sm:$0xff]  ;;  %v49_v1 = vld [vmem:[#allocation3 + $0x8] sm:$0xff]  ;;  %vm45_vm1 = vcmask 25600   ;;  %v69_v12 = vlaneseq }
  0x27   :  { %v52_v2 = vcombine.high %v48_v0, %v48_v0  ;;  %v57_v3 = vsel %vm56_vm0, %v48_v0, 0.0  ;;  %v53_v4 = vcombine.high %v49_v1, %v49_v1  ;;  %v62_v6 = vsel %vm56_vm0, %v49_v1, 0.0  ;;  %v90_v11 = vld [vmem:[#allocation6] sm:$0xf]  ;;  %v192_v25 = vld [vmem:[%s358_s2] ss:$0 sm:$0xff] }
  0x28   :  { %v287_v10 = vmov 0.0   ;;  %vm288_vm2 = vmmov 0   ;;  %v70_v13 = vand.u32 127, %v69_v12  ;;  %v72_v14 = vshrl.u32 %v69_v12, 7  ;;  %s289_s11 = smov [#allocation8]  }
  0x29   :  { %v58_v5 = vsel %vm56_vm0, %v52_v2, 0.0  ;;  %v63_v7 = vsel %vm56_vm0, %v53_v4, 0.0  ;;  %46 = vst.msk [vmem:[#allocation2] sm:$0x3] %vm45_vm1, %v287_v10  ;;  %197 = vmatprep.subr.mxu0 %v287_v10  ;;  %199 = vmatprep.mubr.msk.f32.mxu0 %vm288_vm2, %v287_v10  ;;  %vm79_vm3 = vcmask 1041409   ;;  %vm98_vm4 = vcmask 31744  }
  0x2a   :  { %v59_v8 = vadd.f32 %v58_v5, %v57_v3  ;;  %v64_v9 = vadd.f32 %v63_v7, %v62_v6  ;;  %198 = vmatpush3.msk.msra.mxu0 %vm56_vm0, %v90_v11  ;;  %v73_v16 = vsub.s32 %v70_v13, %v72_v14  ;;  %s182_s12 = sshll.u32 %s289_s11, 4  ;;  %s183_s12 = int_to_ptr.vmem [resolvable:$true] %s182_s12 }
  0x2b   :  { %s255_s13 = scalar_lea.vmem %s183_s12, 32  ;;  %p260_p3 = scmp.lt.s32.totalorder %s183_s12, %s183_s12 }
  0x2c   :  { %60 = vadd.xlane.f32.xlu0 %v59_v8  ;;  %p256_p2 = scmp.ne.s32.totalorder %s183_s12, %s255_s13  ;;  %p261_p4 = scmp.lt.s32.totalorder %s255_s13, %s255_s13 }
  0x2e   :  { %p262_p5 = por %p261_p4, %p260_p3 }
  0x30   :  { %65 = vadd.xlane.f32.xlu0 %v64_v9  ;;  %v47_v20 = vld [vmem:[#allocation2] sm:$0x3]  ;;  %p263_p6 = pnand %p262_p5, %p256_p2 }
  0xb9   :  { %v61_v15 = vpop.xlane.xlu0 %60 }
  0xba   :  { %v74_v18 = vrot.slane %v61_v15, %v73_v16 }
  0xbd   :  { %v66_v17 = vpop.xlane.xlu0 %65 }
  0xbe   :  { %v78_v19 = vrot.slane %v66_v17, %v73_v16 }
  0xc0   :  { %v80_v21 = vsel %vm79_vm3, %v78_v19, %v74_v18 }
  0xc1   :  { %v82_v22 = vadd.f32 %v80_v21, %v47_v20 }
  0xc3   :  { %84 = vst.msk [vmem:[#allocation2] sm:$0x3] %vm45_vm1, %v82_v22 }
  0xca   :  { %v88_v23 = vld [vmem:[#allocation2] sm:$0x3] }
  0xcb   :  { %v89_v24 = vmul.f32 0.00390625, %v88_v23 }
  0xcd   :  { %200 = vmatmul.mubr.msk.f32.vlgmr.msra.gmra.mrb[0].mxu0 %vm98_vm4, %v89_v24 }
 0x1a0   :  { %v171_v26 = vpop.f32.mrb[0].mxu0 }
 0x1a1   :  { %v172_v27 = vadd.f32 %v192_v25, %v171_v26  ;;  %v201_v28 = vpop.f32.mrb[1].mxu0 }
 0x1a3   :  { %175 = vst [vmem:[#allocation8] sm:$0x3] %v172_v27 }
 0x1a4   :  { %266 = shalt.err (!%p263_p6)
}
 0x1a5   :  { %s267_s16 = scalar_lea.hbm %s359_s3, 32 }
 0x1a6   :  { %p268_p7 = scmp.ne.s32.totalorder %s359_s3, %s267_s16  ;;  %p271_p8 = scmp.lt.u32.totalorder %s267_s16, %s359_s3 }
 0x1a8   :  { %p273_p9 = pnand %p271_p8, %p268_p7 }
 0x1aa   :  { %276 = shalt.err (!%p273_p9)
}
 0x1ab   :  { %185 = dma.vmem_to_hbm [thread:$0]  %s183_s12, 32, %s359_s3, [#allocation5]  }
 0x1ac   :  { %281 = dma.done.wait [#allocation5], 32  }
 0x1ad   :  { %282 = vsyncadd [#allocation5], 4294967264 }
 0x1ae   :  { %189 = vsyncpa [#allocation4], 1 }
 0x1af   :  { %190 = vsyncpa [#allocation7], 1 }
 0x1b0   :  { %191 = vsyncpa [#allocation5], 1 }

</bundles_post_ra>
